<compile_context>
chip_gen: v6e
topology: v6e:2x2x1
jax: 0.10.0
libtpu: 0.0.40
codegen_flags: <defaults>
</compile_context>

<pallas_src>
import functools
import math

import jax
import jax.numpy as jnp
from jax.experimental import pallas as pl
from jax.experimental.pallas import tpu as pltpu


def _context_attention_kernel(num_heads, head_dim_p,
                              x_ref, y_ref,
                              wq_ref, bq_ref,
                              wkv_ref, bkv_ref,
                              wo_ref, bo_ref,
                              out_ref,
                              k_sc, v_sc):
    """One (batch element, T-tile) grid step.

    x_ref  : (tq, C)        query-side tokens (batch dim squeezed)
    y_ref  : (S,  C)        key/value-side tokens
    wq_ref : (C, Ep)        pre-scaled by head_dim**-0.5, head-dim padded to hdp
    bq_ref : (1, Ep)
    wkv_ref: (C, 2*Ep)      fused [Wk | Wv], head-dim padded
    bkv_ref: (1, 2*Ep)
    wo_ref : (H, hdp, Cop)  per-head output projection slabs, lane padded
    bo_ref : (1, Cop)
    out_ref: (tq, Cop)      lane-dense output tile (Cop multiple of 128)
    k_sc   : (H, S, hdp)    persistent VMEM scratch (compute dtype)
    v_sc   : (H, S, hdp)    persistent VMEM scratch (compute dtype)
    """
    H = num_heads
    hdp = head_dim_p
    Ep = H * hdp
    cdt = x_ref.dtype            # model compute dtype (bf16/f32); f32 only for acc/softmax

    # --- K/V projection + per-head relayout: once per batch element (qi == 0) ----
    @pl.when(pl.program_id(1) == 0)
    def _():
        kv = jnp.dot(y_ref[...], wkv_ref[...],
                     preferred_element_type=jnp.float32) + bkv_ref[...]
        kv = kv.astype(cdt)                               # back to compute dtype
        # hdp is a multiple of 128 -> aligned lane slices, no lane rotations.
        k_sc[...] = jnp.stack(
            [kv[:, h * hdp:(h + 1) * hdp] for h in range(H)], axis=0)
        v_sc[...] = jnp.stack(
            [kv[:, Ep + h * hdp:Ep + (h + 1) * hdp] for h in range(H)], axis=0)

    # --- Q projection (attention scale folded into Wq/bq at prep time) -----------
    q2 = jnp.dot(x_ref[...], wq_ref[...],
                 preferred_element_type=jnp.float32) + bq_ref[...]
    q2 = q2.astype(cdt)
    q3 = jnp.stack([q2[:, h * hdp:(h + 1) * hdp] for h in range(H)], axis=0)  # (H,tq,hdp)

    # --- Scores: one head-batched matmul, f32 MXU accumulation --------------------
    s = jnp.einsum('hqd,hkd->hqk', q3, k_sc[...],
                   preferred_element_type=jnp.float32)     # (H, tq, S)

    # use_scalar_bias=True: softmax over [0, s_0, ..., s_{S-1}] with a zero value
    # row (the bias element contributes only to the denominator).
    m = jnp.maximum(jnp.max(s, axis=-1, keepdims=True), 0.0)
    p = jnp.exp(s - m)
    denom = jnp.sum(p, axis=-1, keepdims=True) + jnp.exp(-m)   # (H, tq, 1)

    # PV matmul on the un-normalized probabilities; normalize afterwards on the
    # small (H, tq, hdp) accumulator with an exact reciprocal.
    attn = jnp.einsum('hqk,hkd->hqd', p.astype(cdt), v_sc[...],
                      preferred_element_type=jnp.float32)
    attn = (attn * pl.reciprocal(denom)).astype(cdt)       # (H, tq, hdp)

    # --- Output projection: per-head MXU partials into ONE (tq, Cop) f32 acc ------
    acc = jnp.zeros(out_ref.shape, jnp.float32)
    for h in range(H):                                     # H is small and static
        acc = acc + jnp.dot(attn[h], wo_ref[h],
                            preferred_element_type=jnp.float32)
    out_ref[...] = (acc + bo_ref[...]).astype(out_ref.dtype)


def _round_up(v, m):
    return ((v + m - 1) // m) * m


def prepare_params(params, num_heads, dtype=None):
    """One-time, free parameter transform (model-build time, not per call):
      * fold the head_dim**-0.5 scale into Wq/bq,
      * fuse Wk/Wv (and biases) into one (C, 2*Ep) matmul,
      * zero-pad head_dim to a multiple of 128 so head boundaries are lane-tile
        aligned (padded q/k/v columns are exactly zero, so scores, attention and
        the zero-padded Wo rows contribute nothing),
      * pad the output channel dim to a lane-dense multiple of 128,
      * cast everything to the model compute dtype (bf16 on v6e/v7x, f32 on v5e).
    """
    C, E = params["wq"].shape
    assert E % num_heads == 0, (E, num_heads)
    hd = E // num_heads
    hdp = _round_up(hd, 128)
    Ep = num_heads * hdp
    Co = params["wo"].shape[1]
    Cop = _round_up(Co, 128)
    scale = hd ** -0.5
    if dtype is None:
        dtype = params["wq"].dtype

    def pad_heads_2d(w):                       # (C, E) -> (C, Ep), head-aligned
        w = w.reshape(C, num_heads, hd)
        w = jnp.pad(w, ((0, 0), (0, 0), (0, hdp - hd)))
        return w.reshape(C, Ep)

    def pad_heads_bias(b):                     # (1, E) -> (1, Ep)
        b = b.reshape(num_heads, hd)
        b = jnp.pad(b, ((0, 0), (0, hdp - hd)))
        return b.reshape(1, Ep)

    wq_p = pad_heads_2d(params["wq"]) * scale
    bq_p = pad_heads_bias(params["bq"]) * scale
    wkv_p = jnp.concatenate([pad_heads_2d(params["wk"]),
                             pad_heads_2d(params["wv"])], axis=1)
    bkv_p = jnp.concatenate([pad_heads_bias(params["bk"]),
                             pad_heads_bias(params["bv"])], axis=1)

    wo_p = params["wo"].reshape(num_heads, hd, Co)
    wo_p = jnp.pad(wo_p, ((0, 0), (0, hdp - hd), (0, Cop - Co)))
    bo_p = jnp.pad(params["bo"], ((0, 0), (0, Cop - Co)))

    # TODO(synk): for v6e/v7x, additionally pad the contraction dim C (and the
    # x/y channel dim) to a multiple of 256 to fully fill the 2x256x256 MXU.
    return {
        "wq": wq_p.astype(dtype), "bq": bq_p.astype(dtype),
        "wkv": wkv_p.astype(dtype), "bkv": bkv_p.astype(dtype),
        "wo": wo_p.astype(dtype), "bo": bo_p.astype(dtype),
        "num_heads": num_heads, "head_dim_p": hdp,
        "out_channels": Co, "co_pad": Cop, "dtype": dtype,
    }


def _pick_tq(T, cap=512):
    """Largest divisor of T that is <= cap and a multiple of 8 (sublane tile)."""
    best = 0
    for d in range(8, min(T, cap) + 1, 8):
        if T % d == 0:
            best = d
    if best == 0:
        # TODO(synk): pad T (and mask the tail tile) for large T not divisible by 8.
        best = T
    return best


def _vmem_limit_bytes(tq, S, C, H, hdp, Cop, itemsize):
    """Working-set-derived scoped-VMEM limit, clamped to the device capacity."""
    Ep = H * hdp
    f32 = 4
    weights = (C * Ep + Ep + C * 2 * Ep + 2 * Ep + H * hdp * Cop + Cop) * itemsize
    tiles = 2 * (tq * C + S * C + tq * Cop) * itemsize        # double-buffered I/O
    scratch = 2 * H * S * hdp * itemsize                      # k_sc + v_sc
    temps = (tq * Ep * (f32 + itemsize)                       # q2 (f32) + q3
             + 2 * H * tq * S * f32 + H * tq * S * itemsize   # s, p, p (cast)
             + H * tq * hdp * f32                             # attn accumulator
             + 2 * tq * Cop * f32                             # output accumulator
             + S * 2 * Ep * (f32 + itemsize))                 # kv at qi == 0
    est = weights + tiles + scratch + temps
    try:
        cap = int(getattr(pltpu.get_tpu_info(), "vmem_capacity_bytes", 0))
    except Exception:
        cap = 0
    if cap <= 0:
        cap = 64 * 1024 * 1024            # v7x-safe assumption if query unavailable
    # Never below the 32 MiB default; leave the compiler ~1/4 of VMEM headroom
    # (64 MiB -> 48 MiB on v7x, 128 MiB -> 96 MiB on v5e/v6e).
    return int(min(max(32 * 1024 * 1024, 2 * est), (cap * 3) // 4))


def context_attention(x_tbc, prevys_tbc, prep, inmask=None, incremental_state=None):
    """x_tbc: (T, B, out_channels), prevys_tbc: (S, B, out_channels).

    `inmask` is unused by the reference module (must be None); the
    `incremental_state` branch is identical in the reference, so it is ignored.
    """
    assert inmask is None, "inmask is not supported (reference ignores it)"

    T, B, C = x_tbc.shape
    S = prevys_tbc.shape[0]
    H = prep["num_heads"]
    hdp = prep["head_dim_p"]
    Ep = H * hdp
    Co = prep["out_channels"]
    Cop = prep["co_pad"]
    cdt = prep["dtype"]

    # Batch-major inside the kernel (grid = B "parallel" x T-tiles "arbitrary").
    # TODO(synk): fold these HBM-level layout transposes into TBC BlockSpecs /
    # adjacent ops to save the extra HBM round trips for large T*B*C.
    x = jnp.transpose(x_tbc, (1, 0, 2)).astype(cdt)       # (B, T, C)
    y = jnp.transpose(prevys_tbc, (1, 0, 2)).astype(cdt)  # (B, S, C)

    tq = _pick_tq(T)
    grid = (B, T // tq)

    kernel = functools.partial(_context_attention_kernel, H, hdp)

    # TODO(synk): for very long S on v7x (64 MiB VMEM), tile S with an online
    # (flash-style) softmax and stream K/V per S-tile instead of keeping the
    # full (H, S, hdp) K/V resident in scratch.
    out = pl.pallas_call(
        kernel,
        out_shape=jax.ShapeDtypeStruct((B, T, Cop), cdt),
        grid_spec=pltpu.PrefetchScalarGridSpec(
            num_scalar_prefetch=0,
            grid=grid,
            in_specs=[
                pl.BlockSpec((pl.Squeezed(), tq, C), lambda b, qi: (b, qi, 0)),  # x
                pl.BlockSpec((pl.Squeezed(), S, C), lambda b, qi: (b, 0, 0)),    # prevys
                # Weights/biases: full blocks with constant index maps so they
                # stay resident across the whole grid (no per-step re-DMA).
                pl.BlockSpec((C, Ep), lambda b, qi: (0, 0)),             # Wq (pre-scaled)
                pl.BlockSpec((1, Ep), lambda b, qi: (0, 0)),             # bq
                pl.BlockSpec((C, 2 * Ep), lambda b, qi: (0, 0)),         # [Wk | Wv]
                pl.BlockSpec((1, 2 * Ep), lambda b, qi: (0, 0)),         # [bk | bv]
                pl.BlockSpec((H, hdp, Cop), lambda b, qi: (0, 0, 0)),    # Wo per head
                pl.BlockSpec((1, Cop), lambda b, qi: (0, 0)),            # bo
            ],
            out_specs=pl.BlockSpec((pl.Squeezed(), tq, Cop), lambda b, qi: (b, qi, 0)),
            scratch_shapes=[
                pltpu.VMEM((H, S, hdp), cdt),   # K per head, recomputed at qi == 0
                pltpu.VMEM((H, S, hdp), cdt),   # V per head
            ],
        ),
        compiler_params=pltpu.CompilerParams(
            # B parallel (megacore / 2-TC sharding); the T-tile axis carries the
            # K/V scratch, so it must stay sequential ("arbitrary").
            dimension_semantics=("parallel", "arbitrary"),
            vmem_limit_bytes=_vmem_limit_bytes(tq, S, C, H, hdp, Cop,
                                               jnp.dtype(cdt).itemsize),
        ),
    )(x, y,
      prep["wq"], prep["bq"],
      prep["wkv"], prep["bkv"],
      prep["wo"], prep["bo"])

    # Drop the lane padding, back to fairseq's Time x Batch x Channel layout.
    return jnp.transpose(out[:, :, :Co], (1, 0, 2))


def reference(x_tbc, y_tbc, params, num_heads):
    """Pure-JAX port of the PyTorch forward (for correctness check)."""
    T, B, _ = x_tbc.shape
    S = y_tbc.shape[0]
    E = params["wq"].shape[1]
    hd = E // num_heads

    q = jnp.einsum("tbc,ce->tbe", x_tbc, params["wq"]) + params["bq"][0]
    k = jnp.einsum("sbc,ce->sbe", y_tbc, params["wk"]) + params["bk"][0]
    v = jnp.einsum("sbc,ce->sbe", y_tbc, params["wv"]) + params["bv"][0]
    q = q * (hd ** -0.5)

    q = q.reshape(T, B * num_heads, hd).transpose(1, 0, 2)
    k = k.reshape(S, B * num_heads, hd).transpose(1, 0, 2)
    v = v.reshape(S, B * num_heads, hd).transpose(1, 0, 2)

    scores = jnp.einsum("bth,bsh->bts", q, k)
    zero_col = jnp.zeros((B * num_heads, T, 1), scores.dtype)
    scores = jnp.concatenate([zero_col, scores], axis=-1)     # scalar_bias dim=2
    zero_row = jnp.zeros((B * num_heads, 1, hd), v.dtype)
    v = jnp.concatenate([zero_row, v], axis=1)                # scalar_bias dim=1

    w = jax.nn.softmax(scores, axis=-1)
    attn = jnp.einsum("bts,bsh->bth", w, v)
    attn = attn.transpose(1, 0, 2).reshape(T, B, E)
    return jnp.einsum("tbe,eo->tbo", attn, params["wo"]) + params["bo"][0]


def init_params(key, out_channels, embed_dim):
    """ContextLinear / fairseq Linear init: normal(0, sqrt(1/in)), zero bias.
    Weights stored pre-transposed as (in_features, out_features)."""
    kq, kk, kv, ko = jax.random.split(key, 4)
    std_in = math.sqrt(1.0 / out_channels)
    std_e = math.sqrt(1.0 / embed_dim)
    # TODO(synk): fairseq wraps out_proj in nn.utils.weight_norm; at init the
    # effective weight equals the raw weight, so it is folded in here.
    return {
        "wq": (std_in * jax.random.normal(kq, (out_channels, embed_dim))).astype(jnp.float32),
        "bq": jnp.zeros((1, embed_dim), jnp.float32),
        "wk": (std_in * jax.random.normal(kk, (out_channels, embed_dim))).astype(jnp.float32),
        "bk": jnp.zeros((1, embed_dim), jnp.float32),
        "wv": (std_in * jax.random.normal(kv, (out_channels, embed_dim))).astype(jnp.float32),
        "bv": jnp.zeros((1, embed_dim), jnp.float32),
        "wo": (std_e * jax.random.normal(ko, (embed_dim, out_channels))).astype(jnp.float32),
        "bo": jnp.zeros((1, out_channels), jnp.float32),
    }


if __name__ == "__main__":
    out_channels = 8
    embed_dim = 32
    num_heads = 4
    T, S, B = 8, 12, 2   # tgt_len, src_len, batch

    key = jax.random.PRNGKey(0)
    kp, kx, ky = jax.random.split(key, 3)
    params = init_params(kp, out_channels, embed_dim)

    x = jax.random.normal(kx, (T, B, out_channels), jnp.float32)        # (T, B, C)
    prevys = jax.random.normal(ky, (S, B, out_channels), jnp.float32)   # (S, B, C)

    ref = reference(x, prevys, params, num_heads)

    # f32 compute-dtype path: tight check against the pure-JAX reference.
    prep_f32 = prepare_params(params, num_heads, dtype=jnp.float32)
    out_f32 = jax.block_until_ready(
        context_attention(x, prevys, prep_f32, inmask=None, incremental_state=None))
    assert out_f32.shape == (T, B, out_channels), out_f32.shape
    assert jnp.allclose(out_f32, ref, atol=1e-4, rtol=1e-4), \
        float(jnp.max(jnp.abs(out_f32 - ref)))

    # bf16 compute-dtype path (intended production dtype on v6e/v7x): weights and
    # all MXU inputs are bf16, accumulation / softmax math stay f32.
    prep_bf16 = prepare_params(params, num_heads, dtype=jnp.bfloat16)
    out_bf16 = jax.block_until_ready(
        context_attention(x, prevys, prep_bf16, inmask=None,
                          incremental_state=None)).astype(jnp.float32)
    assert out_bf16.shape == (T, B, out_channels), out_bf16.shape
    assert jnp.allclose(out_bf16, ref, atol=1e-1, rtol=1e-1), \
        float(jnp.max(jnp.abs(out_bf16 - ref)))

    print("KERNEL_OK")
</pallas_src>

<mosaic_0001>
module attributes {stable_mosaic.version = 11 : i64} {
  func.func @_context_attention_kernel(%arg0: i32, %arg1: i32, %arg2: memref<1x8x8xf32, #tpu.memory_space<vmem>>, %arg3: memref<1x12x8xf32, #tpu.memory_space<vmem>>, %arg4: memref<8x512xf32, #tpu.memory_space<vmem>>, %arg5: memref<1x512xf32, #tpu.memory_space<vmem>>, %arg6: memref<8x1024xf32, #tpu.memory_space<vmem>>, %arg7: memref<1x1024xf32, #tpu.memory_space<vmem>>, %arg8: memref<4x128x128xf32, #tpu.memory_space<vmem>>, %arg9: memref<1x128xf32, #tpu.memory_space<vmem>>, %arg10: memref<1x8x128xf32, #tpu.memory_space<vmem>>, %arg11: memref<4x12x128xf32, #tpu.memory_space<vmem>>, %arg12: memref<4x12x128xf32, #tpu.memory_space<vmem>>) attributes {dimension_semantics = [#tpu.dimension_semantics<parallel>, #tpu.dimension_semantics<arbitrary>], iteration_bounds = array<i64: 2, 1>, scalar_prefetch = 0 : i64, scratch_operands = 2 : i64, tpu.core_type = #tpu.core_type<tc>, window_params = [{transform_indices = @transform_0, window_bounds = array<i64: 1, 8, 8>}, {transform_indices = @transform_1, window_bounds = array<i64: 1, 12, 8>}, {pipeline_mode = #tpu.pipeline_mode<synchronous>, transform_indices = @transform_2, window_bounds = array<i64: 8, 512>}, {pipeline_mode = #tpu.pipeline_mode<synchronous>, transform_indices = @transform_3, window_bounds = array<i64: 1, 512>}, {pipeline_mode = #tpu.pipeline_mode<synchronous>, transform_indices = @transform_4, window_bounds = array<i64: 8, 1024>}, {pipeline_mode = #tpu.pipeline_mode<synchronous>, transform_indices = @transform_5, window_bounds = array<i64: 1, 1024>}, {pipeline_mode = #tpu.pipeline_mode<synchronous>, transform_indices = @transform_6, window_bounds = array<i64: 4, 128, 128>}, {pipeline_mode = #tpu.pipeline_mode<synchronous>, transform_indices = @transform_7, window_bounds = array<i64: 1, 128>}, {transform_indices = @transform_8, window_bounds = array<i64: 1, 8, 128>}]} {
    %c0_i32 = arith.constant 0 : i32
    %0 = arith.cmpi eq, %arg1, %c0_i32 : i32
    %1 = arith.extui %0 : i1 to i32
    %c0_i32_0 = arith.constant 0 : i32
    %2 = arith.cmpi ne, %1, %c0_i32_0 : i32
    scf.if %2 {
      %c0_38 = arith.constant 0 : index
      %c0_39 = arith.constant 0 : index
      %c0_40 = arith.constant 0 : index
      %70 = vector.load %arg3[%c0_38, %c0_39, %c0_40] : memref<1x12x8xf32, #tpu.memory_space<vmem>>, vector<1x12x8xf32>
      %71 = vector.shape_cast %70 : vector<1x12x8xf32> to vector<12x8xf32>
      %c0_41 = arith.constant 0 : index
      %c0_42 = arith.constant 0 : index
      %72 = vector.load %arg6[%c0_41, %c0_42] : memref<8x1024xf32, #tpu.memory_space<vmem>>, vector<8x1024xf32>
      %cst_43 = arith.constant dense<0.000000e+00> : vector<12x1024xf32>
      %73 = tpu.matmul %71, %72, %cst_43 {dimension_numbers = #tpu.dot_dimension_numbers<[1], [0], [0], [1], [0, 0, 1, 1], [], []>} : vector<12x8xf32>, vector<8x1024xf32>, vector<12x1024xf32> -> vector<12x1024xf32>
      %c0_44 = arith.constant 0 : index
      %c0_45 = arith.constant 0 : index
      %74 = vector.load %arg7[%c0_44, %c0_45] : memref<1x1024xf32, #tpu.memory_space<vmem>>, vector<1x1024xf32>
      %75 = vector.broadcast %74 : vector<1x1024xf32> to vector<12x1024xf32>
      %76 = arith.addf %73, %75 : vector<12x1024xf32>
      %77 = vector.extract_strided_slice %76 {offsets = [0, 0], sizes = [12, 128], strides = [1, 1]} : vector<12x1024xf32> to vector<12x128xf32>
      %78 = vector.extract_strided_slice %76 {offsets = [0, 128], sizes = [12, 128], strides = [1, 1]} : vector<12x1024xf32> to vector<12x128xf32>
      %79 = vector.extract_strided_slice %76 {offsets = [0, 256], sizes = [12, 128], strides = [1, 1]} : vector<12x1024xf32> to vector<12x128xf32>
      %80 = vector.extract_strided_slice %76 {offsets = [0, 384], sizes = [12, 128], strides = [1, 1]} : vector<12x1024xf32> to vector<12x128xf32>
      %81 = vector.shape_cast %77 : vector<12x128xf32> to vector<1x12x128xf32>
      %82 = vector.shape_cast %78 : vector<12x128xf32> to vector<1x12x128xf32>
      %83 = vector.shape_cast %79 : vector<12x128xf32> to vector<1x12x128xf32>
      %84 = vector.shape_cast %80 : vector<12x128xf32> to vector<1x12x128xf32>
      %85 = tpu.concatenate %81, %82, %83, %84 in 0 : vector<1x12x128xf32>, vector<1x12x128xf32>, vector<1x12x128xf32>, vector<1x12x128xf32> -> vector<4x12x128xf32>
      %c0_46 = arith.constant 0 : index
      %c0_47 = arith.constant 0 : index
      %c0_48 = arith.constant 0 : index
      %86 = vector.load %arg11[%c0_46, %c0_47, %c0_48] : memref<4x12x128xf32, #tpu.memory_space<vmem>>, vector<4x12x128xf32>
      tpu.vector_store %arg11[%c0_46, %c0_47, %c0_48], %85 {strides = array<i32>} : memref<4x12x128xf32, #tpu.memory_space<vmem>>, vector<4x12x128xf32>,
      %87 = vector.extract_strided_slice %76 {offsets = [0, 512], sizes = [12, 128], strides = [1, 1]} : vector<12x1024xf32> to vector<12x128xf32>
      %88 = vector.extract_strided_slice %76 {offsets = [0, 640], sizes = [12, 128], strides = [1, 1]} : vector<12x1024xf32> to vector<12x128xf32>
      %89 = vector.extract_strided_slice %76 {offsets = [0, 768], sizes = [12, 128], strides = [1, 1]} : vector<12x1024xf32> to vector<12x128xf32>
      %90 = vector.extract_strided_slice %76 {offsets = [0, 896], sizes = [12, 128], strides = [1, 1]} : vector<12x1024xf32> to vector<12x128xf32>
      %91 = vector.shape_cast %87 : vector<12x128xf32> to vector<1x12x128xf32>
      %92 = vector.shape_cast %88 : vector<12x128xf32> to vector<1x12x128xf32>
      %93 = vector.shape_cast %89 : vector<12x128xf32> to vector<1x12x128xf32>
      %94 = vector.shape_cast %90 : vector<12x128xf32> to vector<1x12x128xf32>
      %95 = tpu.concatenate %91, %92, %93, %94 in 0 : vector<1x12x128xf32>, vector<1x12x128xf32>, vector<1x12x128xf32>, vector<1x12x128xf32> -> vector<4x12x128xf32>
      %c0_49 = arith.constant 0 : index
      %c0_50 = arith.constant 0 : index
      %c0_51 = arith.constant 0 : index
      %96 = vector.load %arg12[%c0_49, %c0_50, %c0_51] : memref<4x12x128xf32, #tpu.memory_space<vmem>>, vector<4x12x128xf32>
      tpu.vector_store %arg12[%c0_49, %c0_50, %c0_51], %95 {strides = array<i32>} : memref<4x12x128xf32, #tpu.memory_space<vmem>>, vector<4x12x128xf32>,
    } else {
    }
    %c0 = arith.constant 0 : index
    %c0_1 = arith.constant 0 : index
    %c0_2 = arith.constant 0 : index
    %3 = vector.load %arg2[%c0, %c0_1, %c0_2] : memref<1x8x8xf32, #tpu.memory_space<vmem>>, vector<1x8x8xf32>
    %4 = vector.shape_cast %3 : vector<1x8x8xf32> to vector<8x8xf32>
    %c0_3 = arith.constant 0 : index
    %c0_4 = arith.constant 0 : index
    %5 = vector.load %arg4[%c0_3, %c0_4] : memref<8x512xf32, #tpu.memory_space<vmem>>, vector<8x512xf32>
    %cst = arith.constant dense<0.000000e+00> : vector<8x512xf32>
    %6 = tpu.matmul %4, %5, %cst {dimension_numbers = #tpu.dot_dimension_numbers<[1], [0], [0], [1], [0, 0, 1, 1], [], []>} : vector<8x8xf32>, vector<8x512xf32>, vector<8x512xf32> -> vector<8x512xf32>
    %c0_5 = arith.constant 0 : index
    %c0_6 = arith.constant 0 : index
    %7 = vector.load %arg5[%c0_5, %c0_6] : memref<1x512xf32, #tpu.memory_space<vmem>>, vector<1x512xf32>
    %8 = vector.broadcast %7 : vector<1x512xf32> to vector<8x512xf32>
    %9 = arith.addf %6, %8 : vector<8x512xf32>
    %10 = vector.extract_strided_slice %9 {offsets = [0, 0], sizes = [8, 128], strides = [1, 1]} : vector<8x512xf32> to vector<8x128xf32>
    %11 = vector.extract_strided_slice %9 {offsets = [0, 128], sizes = [8, 128], strides = [1, 1]} : vector<8x512xf32> to vector<8x128xf32>
    %12 = vector.extract_strided_slice %9 {offsets = [0, 256], sizes = [8, 128], strides = [1, 1]} : vector<8x512xf32> to vector<8x128xf32>
    %13 = vector.extract_strided_slice %9 {offsets = [0, 384], sizes = [8, 128], strides = [1, 1]} : vector<8x512xf32> to vector<8x128xf32>
    %14 = vector.shape_cast %10 : vector<8x128xf32> to vector<1x8x128xf32>
    %15 = vector.shape_cast %11 : vector<8x128xf32> to vector<1x8x128xf32>
    %16 = vector.shape_cast %12 : vector<8x128xf32> to vector<1x8x128xf32>
    %17 = vector.shape_cast %13 : vector<8x128xf32> to vector<1x8x128xf32>
    %18 = tpu.concatenate %14, %15, %16, %17 in 0 : vector<1x8x128xf32>, vector<1x8x128xf32>, vector<1x8x128xf32>, vector<1x8x128xf32> -> vector<4x8x128xf32>
    %c0_7 = arith.constant 0 : index
    %c0_8 = arith.constant 0 : index
    %c0_9 = arith.constant 0 : index
    %19 = vector.load %arg11[%c0_7, %c0_8, %c0_9] : memref<4x12x128xf32, #tpu.memory_space<vmem>>, vector<4x12x128xf32>
    "tpu.trace_start"() <{level = 10 : i32, message = "hqd,hkd->hqk"}> : () -> ()
    %cst_10 = arith.constant dense<0.000000e+00> : vector<4x8x12xf32>
    %20 = tpu.matmul %18, %19, %cst_10 {dimension_numbers = #tpu.dot_dimension_numbers<[2], [2], [1], [1], [0, 0, 0, 1, 1, 1], [0], [0]>} : vector<4x8x128xf32>, vector<4x12x128xf32>, vector<4x8x12xf32> -> vector<4x8x12xf32>
    "tpu.trace_stop"() : () -> ()
    %cst_11 = arith.constant dense<0xFF800000> : vector<4x8xf32>
    %21 = vector.multi_reduction <maximumf>, %20, %cst_11 [2] : vector<4x8x12xf32> to vector<4x8xf32>
    %22 = vector.shape_cast %21 : vector<4x8xf32> to vector<4x8x1xf32>
    %cst_12 = arith.constant 0.000000e+00 : f32
    %23 = vector.broadcast %cst_12 : f32 to vector<4x8x1xf32>
    %24 = arith.maximumf %22, %23 : vector<4x8x1xf32>
    %25 = vector.broadcast %24 : vector<4x8x1xf32> to vector<4x8x12xf32>
    %26 = arith.subf %20, %25 : vector<4x8x12xf32>
    %27 = math.exp %26 : vector<4x8x12xf32>
    %cst_13 = arith.constant dense<0.000000e+00> : vector<4x8xf32>
    %28 = vector.multi_reduction <add>, %27, %cst_13 [2] : vector<4x8x12xf32> to vector<4x8xf32>
    %29 = vector.shape_cast %28 : vector<4x8xf32> to vector<4x8x1xf32>
    %cst_14 = arith.constant 0.000000e+00 : f32
    %30 = vector.broadcast %cst_14 : f32 to vector<4x8x1xf32>
    %31 = arith.subf %30, %24 : vector<4x8x1xf32>
    %32 = math.exp %31 : vector<4x8x1xf32>
    %33 = arith.addf %29, %32 : vector<4x8x1xf32>
    %c0_15 = arith.constant 0 : index
    %c0_16 = arith.constant 0 : index
    %c0_17 = arith.constant 0 : index
    %34 = vector.load %arg12[%c0_15, %c0_16, %c0_17] : memref<4x12x128xf32, #tpu.memory_space<vmem>>, vector<4x12x128xf32>
    "tpu.trace_start"() <{level = 10 : i32, message = "hqk,hkd->hqd"}> : () -> ()
    %cst_18 = arith.constant dense<0.000000e+00> : vector<4x8x128xf32>
    %35 = tpu.matmul %27, %34, %cst_18 {dimension_numbers = #tpu.dot_dimension_numbers<[2], [1], [1], [2], [0, 0, 0, 1, 1, 2], [0], [0]>} : vector<4x8x12xf32>, vector<4x12x128xf32>, vector<4x8x128xf32> -> vector<4x8x128xf32>
    "tpu.trace_stop"() : () -> ()
    %36 = tpu.reciprocal %33 : vector<4x8x1xf32> -> vector<4x8x1xf32>
    %37 = vector.broadcast %36 : vector<4x8x1xf32> to vector<4x8x128xf32>
    %38 = arith.mulf %35, %37 : vector<4x8x128xf32>
    %cst_19 = arith.constant 0.000000e+00 : f32
    %39 = vector.broadcast %cst_19 : f32 to vector<8x128xf32>
    %40 = vector.extract_strided_slice %38 {offsets = [0, 0, 0], sizes = [1, 8, 128], strides = [1, 1, 1]} : vector<4x8x128xf32> to vector<1x8x128xf32>
    %41 = vector.shape_cast %40 : vector<1x8x128xf32> to vector<8x128xf32>
    %c0_20 = arith.constant 0 : index
    %c0_21 = arith.constant 0 : index
    %c0_22 = arith.constant 0 : index
    %42 = vector.load %arg8[%c0_20, %c0_21, %c0_22] : memref<4x128x128xf32, #tpu.memory_space<vmem>>, vector<1x128x128xf32>
    %43 = vector.shape_cast %42 : vector<1x128x128xf32> to vector<128x128xf32>
    %cst_23 = arith.constant dense<0.000000e+00> : vector<8x128xf32>
    %44 = tpu.matmul %41, %43, %cst_23 {dimension_numbers = #tpu.dot_dimension_numbers<[1], [0], [0], [1], [0, 0, 1, 1], [], []>} : vector<8x128xf32>, vector<128x128xf32>, vector<8x128xf32> -> vector<8x128xf32>
    %45 = arith.addf %39, %44 : vector<8x128xf32>
    %46 = vector.extract_strided_slice %38 {offsets = [1, 0, 0], sizes = [1, 8, 128], strides = [1, 1, 1]} : vector<4x8x128xf32> to vector<1x8x128xf32>
    %47 = vector.shape_cast %46 : vector<1x8x128xf32> to vector<8x128xf32>
    %c1 = arith.constant 1 : index
    %c0_24 = arith.constant 0 : index
    %c0_25 = arith.constant 0 : index
    %48 = vector.load %arg8[%c1, %c0_24, %c0_25] : memref<4x128x128xf32, #tpu.memory_space<vmem>>, vector<1x128x128xf32>
    %49 = vector.shape_cast %48 : vector<1x128x128xf32> to vector<128x128xf32>
    %cst_26 = arith.constant dense<0.000000e+00> : vector<8x128xf32>
    %50 = tpu.matmul %47, %49, %cst_26 {dimension_numbers = #tpu.dot_dimension_numbers<[1], [0], [0], [1], [0, 0, 1, 1], [], []>} : vector<8x128xf32>, vector<128x128xf32>, vector<8x128xf32> -> vector<8x128xf32>
    %51 = arith.addf %45, %50 : vector<8x128xf32>
    %52 = vector.extract_strided_slice %38 {offsets = [2, 0, 0], sizes = [1, 8, 128], strides = [1, 1, 1]} : vector<4x8x128xf32> to vector<1x8x128xf32>
    %53 = vector.shape_cast %52 : vector<1x8x128xf32> to vector<8x128xf32>
    %c2 = arith.constant 2 : index
    %c0_27 = arith.constant 0 : index
    %c0_28 = arith.constant 0 : index
    %54 = vector.load %arg8[%c2, %c0_27, %c0_28] : memref<4x128x128xf32, #tpu.memory_space<vmem>>, vector<1x128x128xf32>
    %55 = vector.shape_cast %54 : vector<1x128x128xf32> to vector<128x128xf32>
    %cst_29 = arith.constant dense<0.000000e+00> : vector<8x128xf32>
    %56 = tpu.matmul %53, %55, %cst_29 {dimension_numbers = #tpu.dot_dimension_numbers<[1], [0], [0], [1], [0, 0, 1, 1], [], []>} : vector<8x128xf32>, vector<128x128xf32>, vector<8x128xf32> -> vector<8x128xf32>
    %57 = arith.addf %51, %56 : vector<8x128xf32>
    %58 = vector.extract_strided_slice %38 {offsets = [3, 0, 0], sizes = [1, 8, 128], strides = [1, 1, 1]} : vector<4x8x128xf32> to vector<1x8x128xf32>
    %59 = vector.shape_cast %58 : vector<1x8x128xf32> to vector<8x128xf32>
    %c3 = arith.constant 3 : index
    %c0_30 = arith.constant 0 : index
    %c0_31 = arith.constant 0 : index
    %60 = vector.load %arg8[%c3, %c0_30, %c0_31] : memref<4x128x128xf32, #tpu.memory_space<vmem>>, vector<1x128x128xf32>
    %61 = vector.shape_cast %60 : vector<1x128x128xf32> to vector<128x128xf32>
    %cst_32 = arith.constant dense<0.000000e+00> : vector<8x128xf32>
    %62 = tpu.matmul %59, %61, %cst_32 {dimension_numbers = #tpu.dot_dimension_numbers<[1], [0], [0], [1], [0, 0, 1, 1], [], []>} : vector<8x128xf32>, vector<128x128xf32>, vector<8x128xf32> -> vector<8x128xf32>
    %63 = arith.addf %57, %62 : vector<8x128xf32>
    %c0_33 = arith.constant 0 : index
    %c0_34 = arith.constant 0 : index
    %64 = vector.load %arg9[%c0_33, %c0_34] : memref<1x128xf32, #tpu.memory_space<vmem>>, vector<1x128xf32>
    %65 = vector.broadcast %64 : vector<1x128xf32> to vector<8x128xf32>
    %66 = arith.addf %63, %65 : vector<8x128xf32>
    %c0_35 = arith.constant 0 : index
    %c0_36 = arith.constant 0 : index
    %c0_37 = arith.constant 0 : index
    %67 = vector.load %arg10[%c0_35, %c0_36, %c0_37] : memref<1x8x128xf32, #tpu.memory_space<vmem>>, vector<1x8x128xf32>
    %68 = vector.shape_cast %67 : vector<1x8x128xf32> to vector<8x128xf32>
    %69 = vector.shape_cast %66 : vector<8x128xf32> to vector<1x8x128xf32>
    tpu.vector_store %arg10[%c0_35, %c0_36, %c0_37], %69 {strides = array<i32>} : memref<1x8x128xf32, #tpu.memory_space<vmem>>, vector<1x8x128xf32>,
    return
  }
  func.func @transform_0(%arg0: i32, %arg1: i32) -> (i32, i32, i32) {
    %c0_i32 = arith.constant 0 : i32
    %c0_i32_0 = arith.constant 0 : i32
    return %arg0, %arg1, %c0_i32 : i32, i32, i32
  }
  func.func @transform_1(%arg0: i32, %arg1: i32) -> (i32, i32, i32) {
    %c0_i32 = arith.constant 0 : i32
    %c0_i32_0 = arith.constant 0 : i32
    %c0_i32_1 = arith.constant 0 : i32
    return %arg0, %c0_i32, %c0_i32_0 : i32, i32, i32
  }
  func.func @transform_2(%arg0: i32, %arg1: i32) -> (i32, i32) {
    %c0_i32 = arith.constant 0 : i32
    %c0_i32_0 = arith.constant 0 : i32
    %c0_i32_1 = arith.constant 0 : i32
    return %c0_i32, %c0_i32_0 : i32, i32
  }
  func.func @transform_3(%arg0: i32, %arg1: i32) -> (i32, i32) {
    %c0_i32 = arith.constant 0 : i32
    %c0_i32_0 = arith.constant 0 : i32
    %c0_i32_1 = arith.constant 0 : i32
    return %c0_i32, %c0_i32_0 : i32, i32
  }
  func.func @transform_4(%arg0: i32, %arg1: i32) -> (i32, i32) {
    %c0_i32 = arith.constant 0 : i32
    %c0_i32_0 = arith.constant 0 : i32
    %c0_i32_1 = arith.constant 0 : i32
    return %c0_i32, %c0_i32_0 : i32, i32
  }
  func.func @transform_5(%arg0: i32, %arg1: i32) -> (i32, i32) {
    %c0_i32 = arith.constant 0 : i32
    %c0_i32_0 = arith.constant 0 : i32
    %c0_i32_1 = arith.constant 0 : i32
    return %c0_i32, %c0_i32_0 : i32, i32
  }
  func.func @transform_6(%arg0: i32, %arg1: i32) -> (i32, i32, i32) {
    %c0_i32 = arith.constant 0 : i32
    %c0_i32_0 = arith.constant 0 : i32
    %c0_i32_1 = arith.constant 0 : i32
    %c0_i32_2 = arith.constant 0 : i32
    return %c0_i32, %c0_i32_0, %c0_i32_1 : i32, i32, i32
  }
  func.func @transform_7(%arg0: i32, %arg1: i32) -> (i32, i32) {
    %c0_i32 = arith.constant 0 : i32
    %c0_i32_0 = arith.constant 0 : i32
    %c0_i32_1 = arith.constant 0 : i32
    return %c0_i32, %c0_i32_0 : i32, i32
  }
  func.func @transform_8(%arg0: i32, %arg1: i32) -> (i32, i32, i32) {
    %c0_i32 = arith.constant 0 : i32
    %c0_i32_0 = arith.constant 0 : i32
    return %arg0, %arg1, %c0_i32 : i32, i32, i32
  }
}

</mosaic_0001>

<bundles_post_ra>
// kernel: tpu_custom_call.1
= control target key start
LH: loop header
LB: loop body
LE: loop exit
PB: predicated region body
PF: predicated region fallthrough
CT: control target
= control target key end

     0   :  { %13 = vsyncpa [#allocation5], 0  ;;  %s3143_s0 = inlined_call_operand.vmem [shape: f32[2,8,8], index: 0, kind: input, shape index: {}]   ;;  %s3144_s1 = inlined_call_operand.vmem [shape: f32[2,12,8], index: 1, kind: input, shape index: {}]   ;;  %s3145_s2 = inlined_call_operand.vmem [shape: f32[8,512], index: 2, kind: input, shape index: {}]   ;;  %s3146_s3 = inlined_call_operand.hbm [shape: f32[1,512], index: 3, kind: input, shape index: {}]   ;;  %s3147_s4 = inlined_call_operand.hbm [shape: f32[8,1024], index: 4, kind: input, shape index: {}]   ;;  %s3148_s5 = inlined_call_operand.vmem [shape: f32[1,1024], index: 5, kind: input, shape index: {}]   ;;  %s3149_s6 = inlined_call_operand.hbm [shape: f32[4,128,128], index: 6, kind: input, shape index: {}]   ;;  %s3150_s7 = inlined_call_operand.vmem [shape: f32[1,128], index: 7, kind: input, shape index: {}]   ;;  %s3151_s8 = inlined_call_operand.hbm [shape: f32[2,8,128], index: 8, kind: output, shape index: {}]  }
   0x1   :  { %14 = vsyncpa [#allocation8], 0 }
   0x2   :  { %15 = vsyncpa [#allocation6], 0 }
   0x3   :  { %17 = vsyncpa [#allocation6 + $0x1], 0  ;;  %s2757_s27 = smov 0   ;;  %s2759_s28 = smov 0  }
   0x4   :  { %s2761_s29 = smov 0   ;;  %s2763_s30 = smov 0  }
   0x5   :  { %s2765_s9 = smov 0   ;;  %s2767_s10 = smov 0  }
   0x6 LB: > { %s2099_s11 = sadd.s32 4294967295, %s2702_s10   ;;  %s2100_s12 = sadd.s32 4294967294, %s2702_s10   ;;  %s2702_s10 = sphi %s2767_s10, %s23_s10   ;;  %s2698_s9 = sphi %s2765_s9, %s3169_s9   ;;  %s2694_s30 = sphi %s2763_s30, %s3168_s30   ;;  %s2690_s29 = sphi %s2761_s29, %s3167_s29   ;;  %s2686_s28 = sphi %s2759_s28, %s3166_s28   ;;  %s2682_s27 = sphi %s2757_s27, %s3165_s27  }
   0x7   : > { %s35_s13 = sadd.s32 1, %s2698_s9  ;;  %s224_s14 = sadd.s32 1, %s2690_s29 }
   0x8   : > { %p37_p0 = scmp.ge.s32.totalorder %s35_s13, 2  ;;  %p234_p1 = scmp.ne.s32.totalorder %s2690_s29, %s2686_s28 }
   0x9   : > { %p235_p2 = scmp.eq.s32.totalorder %s2099_s11, 1  ;;  %p240_p3 = scmp.ne.s32.totalorder %s2686_s28, %s2682_s27 }
   0xa   : > { %s3171_s13 = smov (%p37_p0, %s35_s13), 0  ;;  %p241_p5 = scmp.eq.s32.totalorder %s2100_s12, 1 }
   0xb   : > { %p2797_p4 = por %p235_p2, %p234_p1  ;;  %s219_s16 = ssub.s32 %s2698_s9, %s3171_s13 }
   0xc   : > { %p2101_p6 = scmp.ge.s32.totalorder %s2702_s10, 1  ;;  %p222_p7 = scmp.eq.s32.totalorder %s219_s16, 0 }
   0xd   : > { %s3156_s15 = scalar_select %p2797_p4, 1, 0 }
   0xe   : > { %p2804_p8 = por %p241_p5, %p240_p3  ;;  %p248_p9 = scmp.lt.s32.totalorder %s2702_s10, 3 }
   0xf   : > { %s2810_s18 = scalar_select %p222_p7, %s2690_s29, %s224_s14  }
  0x10   : > { %s3157_s17 = scalar_select %p2804_p8, 1, 0 }
  0x11   : > { %p2812_p10 = pnand %p2101_p6, %p248_p9  ;;  %p2816_p11 = scmp.eq.s32.totalorder %s2099_s11, 0 }
  0x12   : > { %s2704_s21 = smov [#allocation7]   ;;  %s2705_s24 = smov [#allocation4]  }
  0x13   : > { %s3158_s19 = scalar_select %p2812_p10, 1, 0 }
  0x14   : > { %s3159_s20 = scalar_select %p2816_p11, 1, 0 }
  0x15   : > { %p2440_p12 = pneg %p2812_p10  ;;  %s275_s22 = sshll.u32 %s2704_s21, 4  ;;  %s276_s22 = int_to_ptr.vmem [resolvable:$true] %s275_s22 }
  0x16   : > { %s264_s25 = sshll.u32 %s2705_s24, 4  ;;  %s2551_s26 = scalar_lea.vmem %s276_s22, 1024  ;;  %s265_s25 = int_to_ptr.vmem [resolvable:$true] %s264_s25 }
  0x17   : > { %p2824_p13 = pnand %p2816_p11, %p2440_p12  ;;  %p2552_p1 = scmp.ne.s32.totalorder %s276_s22, %s2551_s26 }
  0x18   : > { %p2559_p5 = scmp.lt.s32.totalorder %s276_s22, %s276_s22  ;;  %p2560_p6 = scmp.lt.s32.totalorder %s2551_s26, %s2551_s26 }
  0x19   : > { %p2542_p0 = pneg %p2824_p13 }
  0x1a   : > { %p2561_p7 = por %p2560_p6, %p2559_p5 }
  0x1b   : > { %p2554_p2 = pnand %p2552_p1, %p2542_p0 }
  0x1d   : > { %p2555_p3 = pneg %p2554_p2 }
  0x1f   : > { %p2562_p9 = pnand %p2561_p7, %p2555_p3 }
  0x21   : > { %2565 = shalt.err (!%p2562_p9)
}
  0x22   : > { %2446 = dma.hbm_to_vmem [thread:$0]  (!%p2824_p13), %s3147_s4, 1024, %s276_s22, [#allocation8]  }
  0x23   : > { %s2577_s14 = scalar_lea.vmem %s265_s25, 64  ;;  %p2585_p1 = scmp.lt.s32.totalorder %s265_s25, %s265_s25 }
  0x24   : > { %p2578_p12 = scmp.ne.s32.totalorder %s265_s25, %s2577_s14  ;;  %p2586_p2 = scmp.lt.s32.totalorder %s2577_s14, %s2577_s14 }
  0x26   : > { %p2580_p8 = pnand %p2578_p12, %p2542_p0  ;;  %p2587_p11 = por %p2586_p2, %p2585_p1 }
  0x28   : > { %p2581_p4 = pneg %p2580_p8 }
  0x2a   : > { %p2588_p10 = pnand %p2587_p11, %p2581_p4 }
  0x2c   : > { %2591 = shalt.err (!%p2588_p10)
}
  0x2d   : > { %2443 = dma.hbm_to_vmem [thread:$0]  (!%p2824_p13), %s3146_s3, 64, %s265_s25, [#allocation5]  }
  0x2e   : > { %s2706_s24 = smov [#allocation9]  }
  0x2f   : > { %s288_s22 = sshll.u32 %s2706_s24, 4  ;;  %s289_s22 = int_to_ptr.vmem [resolvable:$true] %s288_s22 }
  0x30   : > { %s2603_s26 = scalar_lea.vmem %s289_s22, 8192  ;;  %p2611_p6 = scmp.lt.s32.totalorder %s289_s22, %s289_s22 }
  0x31   : > { %p2604_p3 = scmp.ne.s32.totalorder %s289_s22, %s2603_s26  ;;  %p2612_p7 = scmp.lt.s32.totalorder %s2603_s26, %s2603_s26 }
  0x33   : > { %p2606_p8 = pnand %p2604_p3, %p2542_p0  ;;  %p2613_p4 = por %p2612_p7, %p2611_p6 }
  0x35   : > { %p2607_p5 = pneg %p2606_p8 }
  0x37   : > { %p2614_p10 = pnand %p2613_p4, %p2607_p5 }
  0x39   : > { %2617 = shalt.err (!%p2614_p10)
}
  0x3a   : > { %s2707_s11 = smov 128   ;;  %s2708_s12 = smov 8  }
  0x3b   : > { %2449 = dma.hbm_to_vmem [thread:$0]  (!%p2824_p13), %s3149_s6, 8192, %s289_s22, [#allocation8], %s2707_s11, %s2707_s11, %s2708_s12  }
  0x3c   : > { %p3161_p11 = scmp.ne.s32.totalorder %s3158_s19, 0 }
  0x3d   : > { %p3162_p9 = scmp.ne.s32.totalorder (!%p3161_p11), %s3159_s20, 0 }
  0x3e   : > { %325 = sbr.rel (%p3161_p11) target bundleno = 1086 (0x43e), region = 52 }
  0x43   : > { %2669 = dma.done.wait (%p3162_p9), [#allocation5], 64  }
  0x44   : > { %2671 = vsyncadd (%p3162_p9), [#allocation5], 4294967232 }
  0x45   : > { %2673 = dma.done.wait (%p3162_p9), [#allocation8], 9216  }
  0x46   : > { %2675 = vsyncadd (%p3162_p9), [#allocation8], 4294958080  ;;  %p374_p0 = scmp.lt.s32.totalorder %s2694_s30, 1  ;;  %v2709_v0 = vmov 0.0   ;;  %v393_v1 = vld [vmem:[#allocation7 + $0x8] sm:$0xff]  ;;  %v392_v2 = vld [vmem:[#allocation7] sm:$0xff]  ;;  %v402_v16 = vlaneseq }
  0x47   : > { %513 = vmatprep.mubr.f32.mxu0 %v2709_v0  ;;  %590 = vmatprep.mubr.f32.mxu1 %v2709_v0  ;;  %vm442_vm0 = vcmask 64512   ;;  %v397_v4 = vld [vmem:[#allocation7 + $0x28] sm:$0xff]  ;;  %v396_v5 = vld [vmem:[#allocation7 + $0x20] sm:$0xff]  ;;  %v395_v6 = vld [vmem:[#allocation7 + $0x18] sm:$0xff]  ;;  %vm2710_vm1 = vmmov 0   ;;  %vm1302_vm2 = vcmask 1043456  }
  0x48   : > { %s2868_s19 = scalar_select %p374_p0, %s2694_s30, 1  ;;  %479 = vmatprep.subr.mxu0 %v393_v1  ;;  %v775_v7 = vld [vmem:[%s3145_s2 + $0x8] sm:$0xff]  ;;  %v394_v8 = vld [vmem:[#allocation7 + $0x10] sm:$0xff]  ;;  %556 = vmatprep.subr.mxu1 %v395_v6  ;;  %v399_v10 = vld [vmem:[#allocation7 + $0x38] sm:$0xff]  ;;  %v2914_v17 = vshrl.u32 %v402_v16, 7  ;;  %vm1234_vm3 = vcmask 97280  }
  0x49   : > { %480 = vmatpush1.msra.mxu0 %v392_v2  ;;  %557 = vmatpush1.msra.mxu1 %v394_v8  ;;  %v398_v11 = vld [vmem:[#allocation7 + $0x30] sm:$0xff]  ;;  %v774_v12 = vld [vmem:[%s3145_s2] sm:$0xff]  ;;  %s371_s26 = sand.u32 1, %s2686_s28   ;;  %s2134_s25 = sshll.u32 %s2694_s30, 7 }
  0x4a   : > { %s2137_s23 = sshll.u32 %s2868_s19, 4  ;;  %633 = vmatprep.subr.mxu0 %v397_v4  ;;  %710 = vmatprep.subr.mxu1 %v399_v10  ;;  %s2111_s12 = sshll.u32 %s2868_s19, 3  ;;  %v777_v13 = vld [vmem:[%s3145_s2 + $0x18] sm:$0xff]  ;;  %v776_v14 = vld [vmem:[%s3145_s2 + $0x10] sm:$0xff]  ;;  %v404_v18 = vsub.s32 0, %v2914_v17  ;;  %v400_v19 = vld [vmem:[%s3148_s5] sm:$0xff] }
  0x4b   : > { %s385_s24 = scalar_lea.vmem %s3144_s1, %s2137_s23  ;;  %s380_s21 = scalar_lea.vmem %s3143_s0, %s2111_s12  ;;  %v408_v20 = vsub.s32 1, %v2914_v17  ;;  %v412_v23 = vsub.s32 2, %v2914_v17  ;;  %v420_v25 = vsub.s32 4, %v2914_v17  ;;  %v416_v27 = vsub.s32 3, %v2914_v17  ;;  %v778_v54 = vld [vmem:[#allocation4] sm:$0xf] }
  0x4c   : > { %v390_v3 = vld [vmem:[%s385_s24] sm:$0xff]  ;;  %v391_v9 = vld [vmem:[%s385_s24 + $0x8] sm:$0xf]  ;;  %v405_v21 = vrot.slane %v400_v19, %v404_v18  ;;  %v424_v31 = vsub.s32 5, %v2914_v17  ;;  %v428_v38 = vsub.s32 6, %v2914_v17  ;;  %v432_v44 = vsub.s32 7, %v2914_v17  ;;  %s1983_s24 = scalar_lea.hbm %s3151_s8, %s2134_s25 }
  0x4d   : > { %2114 = vmatmul.mubr.msk.f32.vlgmr.msra.gmra.mxu0 %vm442_vm0, %v390_v3  ;;  %2116 = vmatmul.mubr.msk.f32.vlgmr.msra.gmra.mxu1 %vm442_vm0, %v390_v3  ;;  %v773_v15 = vld [vmem:[%s380_s21] sm:$0xff]  ;;  %v409_v22 = vrot.slane %v400_v19, %v408_v20  ;;  %v413_v30 = vrot.slane %v400_v19, %v412_v23  ;;  %v421_v34 = vrot.slane %v400_v19, %v420_v25  ;;  %s2110_s11 = sshll.u32 %s371_s26, 3  ;;  %s1971_s20 = scalar_lea.sflag [#allocation6], %s371_s26 }
  0x4e   : > { %519 = vmatprep.mubr.f32.mxu0 %v2709_v0  ;;  %634 = vmatpush1.msra.mxu0 %v396_v5  ;;  %v417_v37 = vrot.slane %v400_v19, %v416_v27  ;;  %v425_v43 = vrot.slane %v400_v19, %v424_v31  ;;  %v429_v49 = vrot.slane %v400_v19, %v428_v38  ;;  %s373_s23 = scalar_lea.vmem [#allocation10], %s2110_s11  ;;  %p3163_p12 = scmp.ne.s32.totalorder %s3156_s15, 0 }
  0x4f   : > { %834 = vmatprep.subr.mxu0 %v775_v7  ;;  %596 = vmatprep.mubr.f32.mxu1 %v2709_v0  ;;  %v433_v55 = vrot.slane %v400_v19, %v432_v44  ;;  %v783_v62 = vrot.slane %v778_v54, %v404_v18  ;;  %v787_v8 = vrot.slane %v778_v54, %v408_v20  ;;  %s1985_s16 = sshll.u32 %s373_s23, 4  ;;  %s2711_s12 = smov [#allocation10]   ;;  %s1986_s16 = int_to_ptr.vmem [resolvable:$true] %s1985_s16 }
  0x50   : > { %711 = vmatpush1.msra.mxu1 %v398_v11  ;;  %v791_v16 = vrot.slane %v778_v54, %v412_v23  ;;  %v795_v18 = vrot.slane %v778_v54, %v416_v27  ;;  %s2618_s22 = scalar_lea.vmem %s1986_s16, 128  ;;  %s2622_s14 = sshll.u32 %s2711_s12, 4  ;;  %s2623_s14 = int_to_ptr.vmem [resolvable:$false] %s2622_s14 }
  0x51   : > { %2115 = vmatmul.mubr.msk.f32.gmra.mxu0 %vm442_vm0, %v391_v9  ;;  %2117 = vmatmul.mubr.msk.f32.gmra.mxu1 %vm442_vm0, %v391_v9  ;;  %p2619_p13 = scmp.ne.s32.totalorder %s1986_s16, %s2618_s22  ;;  %s2624_s30 = scalar_lea.vmem %s2623_s14, 256 }
  0x52   : > { %667 = vmatprep.mubr.f32.mxu0 %v2709_v0  ;;  %744 = vmatprep.mubr.f32.mxu1 %v2709_v0  ;;  %p2625_p3 = scmp.lt.s32.totalorder %s1986_s16, %s2623_s14  ;;  %p2626_p8 = scmp.lt.s32.totalorder %s2624_s30, %s2618_s22 }
  0x53   : > { %905 = vmatprep.subr.mxu1 %v777_v13  ;;  %p2620_p1 = pnand %p2619_p13, %p3163_p12 }
  0x54   : > { %p2627_p5 = por %p2626_p8, %p2625_p3 }
  0x55   : > { %2118 = vmatmul.mubr.msk.f32.vlgmr.msra.gmra.mxu0 %vm442_vm0, %v390_v3  ;;  %2120 = vmatmul.mubr.msk.f32.vlgmr.msra.gmra.mxu1 %vm442_vm0, %v390_v3  ;;  %p2621_p2 = pneg %p2620_p1 }
  0x56   : > { %835 = vmatpush1.msra.mxu0 %v774_v12  ;;  %673 = vmatprep.mubr.f32.mxu0 %v2709_v0 }
  0x57   : > { %2230 = vmatprep.subr.mxu0 %v2709_v0  ;;  %750 = vmatprep.mubr.f32.mxu1 %v2709_v0  ;;  %p2628_p6 = pnand %p2627_p5, %p2621_p2 }
  0x58   : > { %906 = vmatpush1.msra.mxu1 %v776_v14 }
  0x59   : > { %2119 = vmatmul.mubr.msk.f32.gmra.mxu0 %vm442_vm0, %v391_v9  ;;  %2237 = vmatprep.subr.mxu1 %v2709_v0 }
  0x5a   : > { %868 = vmatprep.mubr.f32.mxu0 %v2709_v0  ;;  %2121 = vmatmul.mubr.msk.f32.gmra.mxu1 %vm442_vm0, %v391_v9 }
  0x5b   : > { %939 = vmatprep.mubr.f32.mxu1 %v2709_v0 }
  0x5d   : > { %2122 = vmatmul.mubr.msk.f32.vlgmr.msra.gmra.mxu0 %vm442_vm0, %v773_v15 }
  0x5e   : > { %2123 = vmatmul.mubr.msk.f32.vlgmr.msra.gmra.mxu1 %vm442_vm0, %v773_v15  ;;  %2234 = vmatprep.mubr.msk.f32.mxu0 %vm2710_vm1, %v2709_v0 }
  0x5f   : > { %2241 = vmatprep.mubr.msk.f32.mxu1 %vm2710_vm1, %v2709_v0 }
 0x10d   : > { %v515_v24 = vpop.f32.mrf.mxu0  ;;  %v592_v33 = vpop.f32.mrf.mxu1 }
 0x10e   : > { %v516_v26 = vadd.f32 %v515_v24, %v405_v21  ;;  %v2927_v36 = vadd.f32 %v592_v33, %v413_v30 }
 0x10f   : > { %v517_v28 = vpop.f32.mrf.mxu0  ;;  %v594_v40 = vpop.f32.mrf.mxu1 }
 0x110   : > { %v518_v29 = vadd.f32 %v517_v28, %v409_v22  ;;  %v2932_v42 = vadd.f32 %v594_v40, %v417_v37 }
 0x111   : > { %v521_v32 = vpop.f32.mrf.mxu0  ;;  %v598_v46 = vpop.f32.mrf.mxu1 }
 0x112   : > { %v522_v35 = vadd.f32 %v521_v32, %v405_v21  ;;  %v599_v48 = vadd.f32 %v598_v46, %v413_v30 }
 0x113   : > { %v523_v39 = vpop.f32.mrf.mxu0  ;;  %v600_v51 = vpop.f32.mrf.mxu1 }
 0x114   : > { %758 = vst [vmem:[#allocation2] sm:$0xf] %v522_v35  ;;  %v524_v41 = vadd.f32 %v523_v39, %v409_v22  ;;  %762 = vst [vmem:[#allocation2 + $0x20] sm:$0xf] %v599_v48  ;;  %v601_v53 = vadd.f32 %v600_v51, %v417_v37 }
 0x115   : > { %v669_v45 = vpop.f32.mrf.mxu0  ;;  %v746_v57 = vpop.f32.mrf.mxu1 }
 0x116   : > { %760 = vst [vmem:[#allocation2 + $0x10] sm:$0xf] %v524_v41  ;;  %v2935_v47 = vadd.f32 %v669_v45, %v421_v34  ;;  %764 = vst [vmem:[#allocation2 + $0x38] sm:$0xf] %v601_v53  ;;  %v2939_v59 = vadd.f32 %v746_v57, %v429_v49 }
 0x117   : > { %v671_v50 = vpop.f32.mrf.mxu0  ;;  %v748_v63 = vpop.f32.mrf.mxu1 }
 0x118   : > { %v2937_v52 = vadd.f32 %v671_v50, %v425_v43  ;;  %v2941_v2 = vadd.f32 %v748_v63, %v433_v55  ;;  %v1643_v63 = vld [vmem:[#allocation9 + $0xf0] sm:$0xff] }
 0x119   : > { %v675_v56 = vpop.f32.mrf.mxu0 }
 0x11a   : > { %v676_v58 = vadd.f32 %v675_v56, %v421_v34  ;;  %v752_v5 = vpop.f32.mrf.mxu1 }
 0x11b   : > { %v677_v60 = vpop.f32.mrf.mxu0  ;;  %v947_v61 = vld [vmem:[#allocation2] sm:$0xf]  ;;  %v753_v6 = vadd.f32 %v752_v5, %v429_v49  ;;  %v1624_v5 = vld [vmem:[#allocation9 + $0x60] sm:$0xff] }
 0x11c   : > { %766 = vst [vmem:[#allocation3 + $0x18] sm:$0xf] %v676_v58  ;;  %v678_v1 = vadd.f32 %v677_v60, %v425_v43  ;;  %2231 = vmatpush3.xpose.msra.mxu0 %v947_v61  ;;  %v754_v9 = vpop.f32.mrf.mxu1  ;;  %v951_v12 = vld [vmem:[#allocation2 + $0x20] sm:$0xf] }
 0x11d   : > { %v870_v3 = vpop.f32.mrf.mxu0  ;;  %v949_v4 = vld [vmem:[#allocation2 + $0x10] sm:$0xf]  ;;  %2232 = vmatprep.subr.mxu0 %v2709_v0  ;;  %770 = vst [vmem:[#allocation3 + $0x8] sm:$0xf] %v753_v6  ;;  %v755_v11 = vadd.f32 %v754_v9, %v433_v55  ;;  %v953_v15 = vld [vmem:[#allocation2 + $0x38] sm:$0xf] }
 0x11e   : > { %768 = vst [vmem:[#allocation3 + $0x20] sm:$0xf] %v678_v1  ;;  %2238 = vmatpush3.xpose.msra.mxu1 %v949_v4  ;;  %v871_v7 = vadd.f32 %v870_v3, %v783_v62  ;;  %v941_v13 = vpop.f32.mrf.mxu1  ;;  %v1644_v62 = vld [vmem:[#allocation9 + $0xf8] sm:$0xff]  ;;  %v1626_v1 = vld [vmem:[#allocation9 + $0x70] sm:$0xff]  ;;  %v1625_v3 = vld [vmem:[#allocation9 + $0x68] sm:$0xff] }
 0x11f   : > { %2239 = vmatprep.subr.mxu1 %v2709_v0  ;;  %v872_v10 = vpop.f32.mrf.mxu0  ;;  %772 = vst [vmem:[#allocation3 + $0x38] sm:$0xf] %v755_v11  ;;  %v942_v20 = vadd.f32 %v941_v13, %v791_v16  ;;  %v1641_v4 = vld [vmem:[#allocation9 + $0xe0] sm:$0xff]  ;;  %v1640_v6 = vld [vmem:[#allocation9 + $0xd8] sm:$0xff]  ;;  %v1622_v9 = vld [vmem:[#allocation9 + $0x50] sm:$0xff] }
 0x120   : > { %2233 = vmatpush3.xpose.msra.mxu0 %v516_v26  ;;  %v873_v14 = vadd.f32 %v872_v10, %v787_v8  ;;  %v943_v19 = vpop.f32.mrf.mxu1  ;;  %v1639_v8 = vld [vmem:[#allocation9 + $0xd0] sm:$0xff]  ;;  %v1638_v10 = vld [vmem:[#allocation9 + $0xc8] sm:$0xff]  ;;  %v1620_v13 = vld [vmem:[#allocation9 + $0x40] sm:$0xff] }
 0x121   : > { %2244 = vmatprep.subr.mxu0 %v2709_v0  ;;  %v944_v21 = vadd.f32 %v943_v19, %v795_v18  ;;  %v1621_v11 = vld [vmem:[#allocation9 + $0x48] sm:$0xff]  ;;  %v1635_v16 = vld [vmem:[#allocation9 + $0xb0] sm:$0xff] }
 0x122   : > { %2240 = vmatpush3.xpose.msra.mxu1 %v518_v29  ;;  %v1618_v18 = vld [vmem:[#allocation9 + $0x30] sm:$0xff]  ;;  %v1634_v19 = vld [vmem:[#allocation9 + $0xa8] sm:$0xff] }
 0x123   : > { %2235 = vmatmul.mubr.f32.vlgmr.msra.gmra.mxu0 %v871_v7  ;;  %2251 = vmatprep.subr.mxu1 %v2709_v0  ;;  %v1292_v22 = vld [vmem:[#allocation3 + $0x18] sm:$0xf]  ;;  %v1623_v7 = vld [vmem:[#allocation9 + $0x58] sm:$0xff] }
 0x124   : > { %2245 = vmatpush3.xpose.msra.mxu0 %v951_v12  ;;  %2248 = vmatprep.mubr.msk.f32.mxu0 %vm2710_vm1, %v2709_v0  ;;  %v1296_v55 = vld [vmem:[#allocation3 + $0x8] sm:$0xf] }
 0x125   : > { %2242 = vmatmul.mubr.f32.vlgmr.msra.gmra.mxu1 %v873_v14  ;;  %2246 = vmatprep.subr.mxu0 %v2709_v0  ;;  %v1294_v17 = vld [vmem:[#allocation3 + $0x20] sm:$0xf]  ;;  %v1637_v12 = vld [vmem:[#allocation9 + $0xc0] sm:$0xff] }
 0x126   : > { %2252 = vmatpush3.xpose.msra.mxu1 %v953_v15  ;;  %2255 = vmatprep.mubr.msk.f32.mxu1 %vm2710_vm1, %v2709_v0  ;;  %v1636_v14 = vld [vmem:[#allocation9 + $0xb8] sm:$0xff] }
 0x127   : > { %2253 = vmatprep.subr.mxu1 %v2709_v0  ;;  %v1619_v15 = vld [vmem:[#allocation9 + $0x38] sm:$0xff] }
 0x128   : > { %2247 = vmatpush3.xpose.msra.mxu0 %v2927_v36 }
 0x129   : > { %2258 = vmatprep.subr.mxu0 %v2709_v0 }
 0x12a   : > { %2254 = vmatpush3.xpose.msra.mxu1 %v2932_v42 }
 0x12b   : > { %2249 = vmatmul.mubr.f32.vlgmr.msra.gmra.mxu0 %v942_v20  ;;  %2265 = vmatprep.subr.mxu1 %v2709_v0  ;;  %v1617_v20 = vld [vmem:[#allocation9 + $0x28] sm:$0xff] }
 0x12c   : > { %2259 = vmatpush3.msk.msra.mxu0 %vm1302_vm2, %v1292_v22  ;;  %2262 = vmatprep.mubr.msk.f32.mxu0 %vm2710_vm1, %v2709_v0  ;;  %v1616_v22 = vld [vmem:[#allocation9 + $0x20] sm:$0xff] }
 0x12d   : > { %2260 = vmatprep.subr.mxu0 %v2709_v0  ;;  %2256 = vmatmul.mubr.f32.vlgmr.msra.gmra.mxu1 %v944_v21  ;;  %v1633_v21 = vld [vmem:[#allocation9 + $0xa0] sm:$0xff] }
 0x12e   : > { %2261 = vmatpush3.msra.mxu0 %v2935_v47  ;;  %2266 = vmatpush3.msk.msra.mxu1 %vm1302_vm2, %v1294_v17  ;;  %v1632_v17 = vld [vmem:[#allocation9 + $0x98] sm:$0xff] }
 0x12f   : > { %2267 = vmatprep.subr.mxu1 %v2709_v0  ;;  %2269 = vmatprep.mubr.msk.f32.mxu1 %vm2710_vm1, %v2709_v0 }
 0x130   : > { %2268 = vmatpush3.msra.mxu1 %v2937_v52  ;;  %2272 = vmatprep.subr.mxu0 %v2709_v0  ;;  %v1298_v52 = vld [vmem:[#allocation3 + $0x38] sm:$0xf] }
 0x131   : > { %2279 = vmatprep.subr.mxu1 %v2709_v0 }
 0x1e3   : > { %v1020_v23 = vpop.f32.mrf.mxu0 }
 0x1e4   : > { %v1235_v28 = vsel %vm1234_vm3, %v1020_v23, -inf }
 0x1e5   : > { %v2236_v24 = vpop.f32.mrf.mxu0  ;;  %v1090_v25 = vpop.f32.mrf.mxu1 }
 0x1e6   : > { %v1238_v26 = vsel %vm1234_vm3, %v1090_v25, -inf  ;;  %v1631_v24 = vld [vmem:[#allocation9 + $0x90] sm:$0xff] }
 0x1e7   : > { %1239 = vmax.xlane.f32.xlu0 %v1238_v26  ;;  %v2243_v27 = vpop.f32.mrf.mxu1  ;;  %v1629_v26 = vld [vmem:[#allocation9 + $0x80] sm:$0xff] }
 0x1e8   : > { %v1614_v27 = vld [vmem:[#allocation9 + $0x10] sm:$0xff] }
 0x1eb   : > { %1236 = vmax.xlane.f32.xlu0 %v1235_v28  ;;  %v1160_v29 = vpop.f32.mrf.mxu0  ;;  %v1613_v28 = vld [vmem:[#allocation9 + $0x8] sm:$0xff] }
 0x1ec   : > { %v1241_v30 = vsel %vm1234_vm3, %v1160_v29, -inf }
 0x1ed   : > { %1242 = vmax.xlane.f32.xlu1 %v1241_v30  ;;  %v1230_v31 = vpop.f32.mrf.mxu1  ;;  %v2250_v32 = vpop.f32.mrf.mxu0 }
 0x1ee   : > { %v1244_v33 = vsel %vm1234_vm3, %v1230_v31, -inf }
 0x1ef   : > { %v2257_v34 = vpop.f32.mrf.mxu1 }
 0x1f1   : > { %1245 = vmax.xlane.f32.xlu1 %v1244_v33 }
 0x270   : > { %v2977_v35 = vpop.xlane.xlu0 %1239 }
 0x271   : > { %v1248_v36 = vmax.f32 %v2977_v35, 0.0 }
 0x273   : > { %v1252_v37 = vsub.f32 %v1090_v25, %v1248_v36  ;;  %v1630_v25 = vld [vmem:[#allocation9 + $0x88] sm:$0xff]  ;;  %v1276_v30 = vsub.f32 0.0, %v1248_v36 }
 0x274   : > { %v2982_v38 = vpop.xlane.xlu0 %1236 }
 0x275   : > { %v1257_v39 = vmul.f32 1.442695, %v1252_v37  ;;  %v1247_v40 = vmax.f32 %v2982_v38, 0.0 }
 0x276   : > { %v2985_v41 = vpop.xlane.xlu1 %1242 }
 0x277   : > { %2516 = vpow2.f32 %v1257_v39  ;;  %v1251_v42 = vsub.f32 %v1020_v23, %v1247_v40  ;;  %v1249_v43 = vmax.f32 %v2985_v41, 0.0  ;;  %v1615_v23 = vld [vmem:[#allocation9 + $0x18] sm:$0xff]  ;;  %v1275_v32 = vsub.f32 0.0, %v1247_v40 }
 0x279   : > { %v1255_v44 = vmul.f32 1.442695, %v1251_v42  ;;  %v1253_v45 = vsub.f32 %v1160_v29, %v1249_v43  ;;  %v1612_v29 = vld [vmem:[#allocation9] sm:$0xff]  ;;  %v1279_v33 = vmul.f32 1.442695, %v1275_v32 }
 0x27a   : > { %v2992_v46 = vpop.xlane.xlu1 %1245  ;;  %v1874_v32 = vld [vmem:[#allocation9 + $0x180] sm:$0xff] }
 0x27b   : > { %2518 = vpow2.f32 %v1255_v44  ;;  %v1259_v47 = vmul.f32 1.442695, %v1253_v45  ;;  %v1250_v48 = vmax.f32 %v2992_v46, 0.0  ;;  %v1889_v46 = vld [vmem:[#allocation9 + $0x1f8] sm:$0xff] }
 0x27d   : > { %2520 = vpow2.f32 %v1259_v47  ;;  %v1254_v49 = vsub.f32 %v1230_v31, %v1250_v48  ;;  %v1281_v31 = vmul.f32 1.442695, %v1276_v30  ;;  %v1277_v47 = vsub.f32 0.0, %v1249_v43  ;;  %v1799_v43 = vld [vmem:[#allocation9 + $0x168] sm:$0xff] }
 0x27e   : > { %v1278_v36 = vsub.f32 0.0, %v1250_v48 }
 0x27f   : > { %v1261_v50 = vmul.f32 1.442695, %v1254_v49  ;;  %v1283_v35 = vmul.f32 1.442695, %v1277_v47 }
 0x280   : > { %v1285_v49 = vmul.f32 1.442695, %v1278_v36 }
 0x281   : > { %2522 = vpow2.f32 %v1261_v50 }
 0x282   : > { %2524 = vpow2.f32 %v1281_v31  ;;  %v1875_v31 = vld [vmem:[#allocation9 + $0x188] sm:$0xff] }
 0x283   : > { %2526 = vpow2.f32 %v1279_v33 }
 0x284   : > { %v2517_v51 = vpop.eup %2516 }
 0x285   : > { %2270 = vmatmul.mubr.msk.f32.vlgmr.msra.gmra.mxu1 %vm1234_vm3, %v2517_v51  ;;  %v1266_v53 = vsel %vm1234_vm3, %v2517_v51, 0.0  ;;  %v1801_v51 = vld [vmem:[#allocation9 + $0x178] sm:$0xff] }
 0x286   : > { %2280 = vmatpush3.msk.msra.mxu1 %vm1302_vm2, %v1298_v52  ;;  %1267 = vadd.xlane.f32.xlu0 %v1266_v53  ;;  %v1800_v53 = vld [vmem:[#allocation9 + $0x170] sm:$0xff] }
 0x287   : > { %2281 = vmatprep.subr.mxu1 %v2709_v0  ;;  %2283 = vmatprep.mubr.msk.f32.mxu1 %vm2710_vm1, %v2709_v0 }
 0x288   : > { %v2519_v54 = vpop.eup %2518  ;;  %2282 = vmatpush3.msra.mxu1 %v2941_v2  ;;  %v1642_v2 = vld [vmem:[#allocation9 + $0xe8] sm:$0xff] }
 0x289   : > { %2263 = vmatmul.mubr.msk.f32.vlgmr.msra.gmra.mxu0 %vm1234_vm3, %v2519_v54  ;;  %v1263_v56 = vsel %vm1234_vm3, %v2519_v54, 0.0  ;;  %2321 = vmatprep.subr.mxu1 %v2709_v0 }
 0x28a   : > { %v2521_v57 = vpop.eup %2520  ;;  %2273 = vmatpush3.msk.msra.mxu0 %vm1302_vm2, %v1296_v55  ;;  %1264 = vadd.xlane.f32.xlu1 %v1263_v56  ;;  %v1798_v56 = vld [vmem:[#allocation9 + $0x160] sm:$0xff] }
 0x28b   : > { %2274 = vmatprep.subr.mxu0 %v2709_v0  ;;  %2276 = vmatprep.mubr.msk.f32.mxu0 %vm2710_vm1, %v2709_v0  ;;  %v1269_v58 = vsel %vm1234_vm3, %v2521_v57, 0.0 }
 0x28c   : > { %2275 = vmatpush3.msra.mxu0 %v2939_v59  ;;  %1270 = vadd.xlane.f32.xlu0 %v1269_v58  ;;  %v1627_v59 = vld [vmem:[#allocation9 + $0x78] sm:$0xff] }
 0x28d   : > { %2277 = vmatmul.mubr.msk.f32.vlgmr.msra.gmra.mxu0 %vm1234_vm3, %v2521_v57  ;;  %2286 = vmatprep.subr.mxu0 %v2709_v0  ;;  %v1888_v57 = vld [vmem:[#allocation9 + $0x1f0] sm:$0xff] }
 0x28e   : > { %v2523_v60 = vpop.eup %2522  ;;  %2318 = vmatprep.mubr.msk.f32.mxu0 %vm2710_vm1, %v2709_v0  ;;  %2287 = vmatpush3.msra.mxu0 %v1644_v62 }
 0x28f   : > { %2284 = vmatmul.mubr.msk.f32.vlgmr.msra.gmra.mxu1 %vm1234_vm3, %v2523_v60  ;;  %v1272_v61 = vsel %vm1234_vm3, %v2523_v60, 0.0  ;;  %2288 = vmatprep.subr.mxu0 %v2709_v0  ;;  %v2525_v37 = vpop.eup %2524  ;;  %v1797_v60 = vld [vmem:[#allocation9 + $0x158] sm:$0xff] }
 0x290   : > { %1273 = vadd.xlane.f32.xlu1 %v1272_v61  ;;  %2353 = vmatprep.mubr.msk.f32.mxu1 %vm2710_vm1, %v2709_v0  ;;  %v2527_v44 = vpop.eup %2526  ;;  %v1887_v61 = vld [vmem:[#allocation9 + $0x1e8] sm:$0xff] }
 0x291   : > { %2322 = vmatpush3.msra.mxu1 %v1627_v59  ;;  %2289 = vmatpush3.msra.mxu0 %v1643_v63  ;;  %v1796_v59 = vld [vmem:[#allocation9 + $0x150] sm:$0xff] }
 0x292   : > { %2323 = vmatprep.subr.mxu1 %v2709_v0  ;;  %2290 = vmatprep.subr.mxu0 %v2709_v0 }
 0x293   : > { %2324 = vmatpush3.msra.mxu1 %v1626_v1  ;;  %2291 = vmatpush3.msra.mxu0 %v1642_v2  ;;  %v1886_v1 = vld [vmem:[#allocation9 + $0x1e0] sm:$0xff] }
 0x294   : > { %2325 = vmatprep.subr.mxu1 %v2709_v0  ;;  %2292 = vmatprep.subr.mxu0 %v2709_v0 }
 0x295   : > { %2326 = vmatpush3.msra.mxu1 %v1625_v3  ;;  %2293 = vmatpush3.msra.mxu0 %v1641_v4  ;;  %v1795_v4 = vld [vmem:[#allocation9 + $0x148] sm:$0xff] }
 0x296   : > { %2327 = vmatprep.subr.mxu1 %v2709_v0  ;;  %2294 = vmatprep.subr.mxu0 %v2709_v0 }
 0x297   : > { %2328 = vmatpush3.msra.mxu1 %v1624_v5  ;;  %2295 = vmatpush3.msra.mxu0 %v1640_v6  ;;  %v1885_v5 = vld [vmem:[#allocation9 + $0x1d8] sm:$0xff] }
 0x298   : > { %2329 = vmatprep.subr.mxu1 %v2709_v0  ;;  %2296 = vmatprep.subr.mxu0 %v2709_v0 }
 0x299   : > { %2330 = vmatpush3.msra.mxu1 %v1623_v7  ;;  %2297 = vmatpush3.msra.mxu0 %v1639_v8  ;;  %v1794_v8 = vld [vmem:[#allocation9 + $0x140] sm:$0xff] }
 0x29a   : > { %2331 = vmatprep.subr.mxu1 %v2709_v0  ;;  %2298 = vmatprep.subr.mxu0 %v2709_v0 }
 0x29b   : > { %2332 = vmatpush3.msra.mxu1 %v1622_v9  ;;  %2299 = vmatpush3.msra.mxu0 %v1638_v10  ;;  %v1884_v9 = vld [vmem:[#allocation9 + $0x1d0] sm:$0xff] }
 0x29c   : > { %2333 = vmatprep.subr.mxu1 %v2709_v0  ;;  %2300 = vmatprep.subr.mxu0 %v2709_v0 }
 0x29d   : > { %2334 = vmatpush3.msra.mxu1 %v1621_v11  ;;  %2301 = vmatpush3.msra.mxu0 %v1637_v12  ;;  %v1793_v11 = vld [vmem:[#allocation9 + $0x138] sm:$0xff]  ;;  %v1883_v12 = vld [vmem:[#allocation9 + $0x1c8] sm:$0xff] }
 0x29e   : > { %2335 = vmatprep.subr.mxu1 %v2709_v0  ;;  %2302 = vmatprep.subr.mxu0 %v2709_v0 }
 0x29f   : > { %2336 = vmatpush3.msra.mxu1 %v1620_v13  ;;  %2303 = vmatpush3.msra.mxu0 %v1636_v14 }
 0x2a0   : > { %2337 = vmatprep.subr.mxu1 %v2709_v0  ;;  %2304 = vmatprep.subr.mxu0 %v2709_v0 }
 0x2a1   : > { %2338 = vmatpush3.msra.mxu1 %v1619_v15  ;;  %2305 = vmatpush3.msra.mxu0 %v1635_v16  ;;  %v1792_v15 = vld [vmem:[#allocation9 + $0x130] sm:$0xff]  ;;  %v1882_v16 = vld [vmem:[#allocation9 + $0x1c0] sm:$0xff] }
 0x2a2   : > { %2339 = vmatprep.subr.mxu1 %v2709_v0  ;;  %2306 = vmatprep.subr.mxu0 %v2709_v0 }
 0x2a3   : > { %2340 = vmatpush3.msra.mxu1 %v1618_v18  ;;  %2307 = vmatpush3.msra.mxu0 %v1634_v19  ;;  %v1791_v18 = vld [vmem:[#allocation9 + $0x128] sm:$0xff]  ;;  %v1881_v19 = vld [vmem:[#allocation9 + $0x1b8] sm:$0xff] }
 0x2a4   : > { %2341 = vmatprep.subr.mxu1 %v2709_v0  ;;  %2308 = vmatprep.subr.mxu0 %v2709_v0 }
 0x2a5   : > { %2342 = vmatpush3.msra.mxu1 %v1617_v20  ;;  %2309 = vmatpush3.msra.mxu0 %v1633_v21  ;;  %v1790_v20 = vld [vmem:[#allocation9 + $0x120] sm:$0xff]  ;;  %v1880_v21 = vld [vmem:[#allocation9 + $0x1b0] sm:$0xff] }
 0x2a6   : > { %2343 = vmatprep.subr.mxu1 %v2709_v0  ;;  %2310 = vmatprep.subr.mxu0 %v2709_v0 }
 0x2a7   : > { %2344 = vmatpush3.msra.mxu1 %v1616_v22  ;;  %2311 = vmatpush3.msra.mxu0 %v1632_v17  ;;  %v1789_v22 = vld [vmem:[#allocation9 + $0x118] sm:$0xff]  ;;  %v1879_v17 = vld [vmem:[#allocation9 + $0x1a8] sm:$0xff] }
 0x2a8   : > { %2345 = vmatprep.subr.mxu1 %v2709_v0  ;;  %2312 = vmatprep.subr.mxu0 %v2709_v0 }
 0x2a9   : > { %2346 = vmatpush3.msra.mxu1 %v1615_v23  ;;  %2313 = vmatpush3.msra.mxu0 %v1631_v24  ;;  %v1788_v23 = vld [vmem:[#allocation9 + $0x110] sm:$0xff]  ;;  %v1878_v24 = vld [vmem:[#allocation9 + $0x1a0] sm:$0xff] }
 0x2aa   : > { %2347 = vmatprep.subr.mxu1 %v2709_v0  ;;  %2314 = vmatprep.subr.mxu0 %v2709_v0 }
 0x2ab   : > { %2315 = vmatpush3.msra.mxu0 %v1630_v25  ;;  %2348 = vmatpush3.msra.mxu1 %v1614_v27  ;;  %v1787_v25 = vld [vmem:[#allocation9 + $0x108] sm:$0xff]  ;;  %v1786_v27 = vld [vmem:[#allocation9 + $0x100] sm:$0xff] }
 0x2ac   : > { %2316 = vmatprep.subr.mxu0 %v2709_v0  ;;  %2349 = vmatprep.subr.mxu1 %v2709_v0 }
 0x2ad   : > { %2317 = vmatpush3.msra.mxu0 %v1629_v26  ;;  %2350 = vmatpush3.msra.mxu1 %v1613_v28  ;;  %v1877_v26 = vld [vmem:[#allocation9 + $0x198] sm:$0xff]  ;;  %v1876_v28 = vld [vmem:[#allocation9 + $0x190] sm:$0xff] }
 0x2ae   : > { %2356 = vmatprep.subr.mxu0 %v2709_v0  ;;  %2351 = vmatprep.subr.mxu1 %v2709_v0 }
 0x2af   : > { %2352 = vmatpush3.msra.mxu1 %v1612_v29 }
 0x2b0   : > { %2391 = vmatprep.subr.mxu1 %v2709_v0 }
 0x30f   : > { %v1268_v34 = vpop.xlane.xlu0 %1267 }
 0x310   : > { %v1288_v39 = vadd.f32 %v2525_v37, %v1268_v34 }
 0x312   : > { %2528 = vrcp.f32 %v1288_v39 }
 0x313   : > { %v1265_v42 = vpop.xlane.xlu1 %1264 }
 0x314   : > { %v1287_v45 = vadd.f32 %v2527_v44, %v1265_v42 }
 0x315   : > { %v1271_v2 = vpop.xlane.xlu0 %1270 }
 0x316   : > { %2530 = vrcp.f32 %v1287_v45 }
 0x317   : > { %2532 = vpow2.f32 %v1283_v35 }
 0x318   : > { %2534 = vpow2.f32 %v1285_v49 }
 0x319   : > { %v1274_v10 = vpop.xlane.xlu1 %1273 }
 0x31f   : > { %v2529_v38 = vpop.eup %2528 }
 0x323   : > { %v2531_v54 = vpop.eup %2530 }
 0x324   : > { %v2533_v6 = vpop.eup %2532 }
 0x325   : > { %v1289_v7 = vadd.f32 %v2533_v6, %v1271_v2  ;;  %v2535_v13 = vpop.eup %2534 }
 0x326   : > { %v1290_v14 = vadd.f32 %v2535_v13, %v1274_v10 }
 0x327   : > { %2536 = vrcp.f32 %v1289_v7 }
 0x328   : > { %2538 = vrcp.f32 %v1290_v14 }
 0x334   : > { %v2537_v29 = vpop.eup %2536 }
 0x335   : > { %v2539_v33 = vpop.eup %2538 }
 0x345   : > { %v1448_v40 = vpop.f32.mrf.mxu1 }
 0x346   : > { %v1609_v50 = vmul.f32 %v2529_v38, %v1448_v40  ;;  %v2132_v40 = vld [vmem:[%s3150_s7] ss:$0 sm:$0xff] }
 0x347   : > { %v2271_v52 = vpop.f32.mrf.mxu1 }
 0x348   : > { %2319 = vmatmul.mubr.f32.vlgmr.msra.gmra.mxu0 %v1609_v50 }
 0x349   : > { %2357 = vmatpush3.msra.mxu0 %v1801_v51  ;;  %v1372_v55 = vpop.f32.mrf.mxu0  ;;  %2388 = vmatprep.mubr.msk.f32.mxu0 %vm2710_vm1, %v2709_v0 }
 0x34a   : > { %v1608_v41 = vmul.f32 %v2531_v54, %v1372_v55  ;;  %2358 = vmatprep.subr.mxu0 %v2709_v0 }
 0x34b   : > { %2359 = vmatpush3.msra.mxu0 %v1800_v53  ;;  %v2264_v48 = vpop.f32.mrf.mxu0 }
 0x34c   : > { %2360 = vmatprep.subr.mxu0 %v2709_v0  ;;  %2354 = vmatmul.mubr.f32.vlgmr.msra.gmra.mxu1 %v1608_v41 }
 0x34d   : > { %2361 = vmatpush3.msra.mxu0 %v1799_v43  ;;  %2392 = vmatpush3.msra.mxu1 %v1889_v46  ;;  %v3065_v58 = vpop.f32.mrf.mxu0 }
 0x34e   : > { %2362 = vmatprep.subr.mxu0 %v2709_v0  ;;  %2393 = vmatprep.subr.mxu1 %v2709_v0  ;;  %v1610_v30 = vmul.f32 %v2537_v29, %v3065_v58 }
 0x34f   : > { %2363 = vmatpush3.msra.mxu0 %v1798_v56  ;;  %2394 = vmatpush3.msra.mxu1 %v1888_v57  ;;  %v2278_v62 = vpop.f32.mrf.mxu0  ;;  %v3069_v63 = vpop.f32.mrf.mxu1 }
 0x350   : > { %2364 = vmatprep.subr.mxu0 %v2709_v0  ;;  %2395 = vmatprep.subr.mxu1 %v2709_v0  ;;  %v1611_v34 = vmul.f32 %v2539_v33, %v3069_v63 }
 0x351   : > { %2365 = vmatpush3.msra.mxu0 %v1797_v60  ;;  %2396 = vmatpush3.msra.mxu1 %v1887_v61  ;;  %v2285_v3 = vpop.f32.mrf.mxu1 }
 0x352   : > { %2366 = vmatprep.subr.mxu0 %v2709_v0  ;;  %2397 = vmatprep.subr.mxu1 %v2709_v0 }
 0x353   : > { %2367 = vmatpush3.msra.mxu0 %v1796_v59  ;;  %2398 = vmatpush3.msra.mxu1 %v1886_v1 }
 0x354   : > { %2368 = vmatprep.subr.mxu0 %v2709_v0  ;;  %2399 = vmatprep.subr.mxu1 %v2709_v0 }
 0x355   : > { %2369 = vmatpush3.msra.mxu0 %v1795_v4  ;;  %2400 = vmatpush3.msra.mxu1 %v1885_v5 }
 0x356   : > { %2370 = vmatprep.subr.mxu0 %v2709_v0  ;;  %2401 = vmatprep.subr.mxu1 %v2709_v0 }
 0x357   : > { %2371 = vmatpush3.msra.mxu0 %v1794_v8  ;;  %2402 = vmatpush3.msra.mxu1 %v1884_v9 }
 0x358   : > { %2372 = vmatprep.subr.mxu0 %v2709_v0  ;;  %2403 = vmatprep.subr.mxu1 %v2709_v0 }
 0x359   : > { %2373 = vmatpush3.msra.mxu0 %v1793_v11  ;;  %2404 = vmatpush3.msra.mxu1 %v1883_v12 }
 0x35a   : > { %2374 = vmatprep.subr.mxu0 %v2709_v0  ;;  %2405 = vmatprep.subr.mxu1 %v2709_v0 }
 0x35b   : > { %2375 = vmatpush3.msra.mxu0 %v1792_v15  ;;  %2406 = vmatpush3.msra.mxu1 %v1882_v16 }
 0x35c   : > { %2376 = vmatprep.subr.mxu0 %v2709_v0  ;;  %2407 = vmatprep.subr.mxu1 %v2709_v0 }
 0x35d   : > { %2377 = vmatpush3.msra.mxu0 %v1791_v18  ;;  %2408 = vmatpush3.msra.mxu1 %v1881_v19 }
 0x35e   : > { %2378 = vmatprep.subr.mxu0 %v2709_v0  ;;  %2409 = vmatprep.subr.mxu1 %v2709_v0 }
 0x35f   : > { %2379 = vmatpush3.msra.mxu0 %v1790_v20  ;;  %2410 = vmatpush3.msra.mxu1 %v1880_v21 }
 0x360   : > { %2380 = vmatprep.subr.mxu0 %v2709_v0  ;;  %2411 = vmatprep.subr.mxu1 %v2709_v0 }
 0x361   : > { %2381 = vmatpush3.msra.mxu0 %v1789_v22  ;;  %2412 = vmatpush3.msra.mxu1 %v1879_v17 }
 0x362   : > { %2382 = vmatprep.subr.mxu0 %v2709_v0  ;;  %2413 = vmatprep.subr.mxu1 %v2709_v0 }
 0x363   : > { %2383 = vmatpush3.msra.mxu0 %v1788_v23  ;;  %2414 = vmatpush3.msra.mxu1 %v1878_v24 }
 0x364   : > { %2384 = vmatprep.subr.mxu0 %v2709_v0  ;;  %2415 = vmatprep.subr.mxu1 %v2709_v0 }
 0x365   : > { %2385 = vmatpush3.msra.mxu0 %v1787_v25  ;;  %2416 = vmatpush3.msra.mxu1 %v1877_v26 }
 0x366   : > { %2386 = vmatprep.subr.mxu0 %v2709_v0  ;;  %2417 = vmatprep.subr.mxu1 %v2709_v0 }
 0x367   : > { %2387 = vmatpush3.msra.mxu0 %v1786_v27  ;;  %2418 = vmatpush3.msra.mxu1 %v1876_v28 }
 0x368   : > { %2389 = vmatmul.mubr.f32.vlgmr.msra.gmra.mxu0 %v1610_v30  ;;  %2419 = vmatprep.subr.mxu1 %v2709_v0 }
 0x369   : > { %2420 = vmatpush3.msra.mxu1 %v1875_v31  ;;  %2423 = vmatprep.mubr.msk.f32.mxu1 %vm2710_vm1, %v2709_v0 }
 0x36a   : > { %2421 = vmatprep.subr.mxu1 %v2709_v0 }
 0x36b   : > { %2422 = vmatpush3.msra.mxu1 %v1874_v32 }
 0x36c   : > { %2424 = vmatmul.mubr.f32.vlgmr.msra.gmra.mxu1 %v1611_v34 }
 0x408   : > { %v1711_v37 = vpop.f32.mrf.mxu0 }
 0x40a   : > { %v2320_v39 = vpop.f32.mrf.mxu0 }
 0x40c   : > { %v1781_v42 = vpop.f32.mrf.mxu1 }
 0x40d   : > { %v1782_v47 = vadd.f32 %v1781_v42, %v1711_v37 }
 0x40e   : > { %v2355_v44 = vpop.f32.mrf.mxu1 }
 0x428   : > { %v1868_v45 = vpop.f32.mrf.mxu0 }
 0x429   : > { %v1872_v36 = vadd.f32 %v1868_v45, %v1782_v47 }
 0x42a   : > { %v2390_v35 = vpop.f32.mrf.mxu0 }
 0x42c   : > { %v1956_v38 = vpop.f32.mrf.mxu1 }
 0x42d   : > { %v1960_v0 = vadd.f32 %v1956_v38, %v1872_v36 }
 0x42e   : > { %v2425_v49 = vpop.f32.mrf.mxu1 }
 0x42f   : > { %v1968_v50 = vadd.f32 %v2132_v40, %v1960_v0 }
 0x431   : > { %1969 = vst [vmem:[%s373_s23] sm:$0xff] %v1968_v50 }
 0x432   : > { %2631 = shalt.err (!%p2628_p6)
}
 0x433   : > { %s2632_s11 = scalar_lea.hbm %s1983_s24, 128  ;;  %s2636_s23 = scalar_lea.hbm %s3151_s8, 256 }
 0x434   : > { %p2633_p7 = scmp.ne.s32.totalorder %s1983_s24, %s2632_s11  ;;  %p2637_p11 = scmp.lt.s32.totalorder %s1983_s24, %s3151_s8 }
 0x435   : > { %p2638_p9 = scmp.lt.s32.totalorder %s2636_s23, %s2632_s11 }
 0x436   : > { %p2634_p4 = pnand %p2633_p7, %p3163_p12 }
 0x437   : > { %p2639_p0 = por %p2638_p9, %p2637_p11 }
 0x438   : > { %p2635_p10 = pneg %p2634_p4 }
 0x43a   : > { %p2640_p13 = pnand %p2639_p0, %p2635_p10 }
 0x43c   : > { %2643 = shalt.err (!%p2640_p13)
}
 0x43d   : > { %2438 = dma.vmem_to_hbm [thread:$0]  (%p3163_p12), %s1986_s16, 128, %s1983_s24, %s1971_s20  }
 0x43e PF: > { %p2460_p1 = scmp.ge.s32.totalorder %s2702_s10, 2  ;;  %s1997_s22 = sand.u32 1, %s2682_s27  }
 0x43f   : > { %p3164_p2 = scmp.ne.s32.totalorder %s3157_s17, 0  ;;  %s1998_s12 = scalar_lea.sflag [#allocation6], %s1997_s22 }
 0x441   : > { %p2451_p3 = pnand %p2460_p1, %p3164_p2 }
 0x443   : > { %p2452_p8 = pneg %p2451_p3 }
 0x445   : > { %2677 = dma.done.wait (%p2452_p8), %s1998_s12, 128  }
 0x446   : > { %2679 = vsyncadd (%p2452_p8), %s1998_s12, 4294967168  ;;  %s23_s10 = sadd.s32 1, %s2702_s10   ;;  %s3165_s27 = smov %s2686_s28 }
 0x447   : > { %p20_p5 = scmp.ge.s32.totalorder %s23_s10, 4   ;;  %s3166_s28 = smov %s2690_s29 }
 0x448   : > { %s3167_s29 = smov %s2810_s18  ;;  %s3168_s30 = smov %s2698_s9 }
 0x449   : > { %s3169_s9 = smov %s3171_s13  ;;  %22 = sbr.rel (!%p20_p5) target bundleno = 6 (0x6), region = 110 }
 0x44e   :  { %2003 = vsyncpa [#allocation5], 1 }
 0x44f   :  { %2005 = vsyncpa [#allocation5 + $0x1], 1 }
 0x450   :  { %2006 = vsyncpa [#allocation8], 1 }
 0x451   :  { %2007 = vsyncpa [#allocation6], 1 }
 0x452   :  { %2009 = vsyncpa [#allocation6 + $0x1], 1 }

</bundles_post_ra>
